<compile_context>
chip_gen: v6e
topology: v6e:2x2x1
jax: 0.10.0
libtpu: 0.0.40
codegen_flags: <defaults>
</compile_context>

<pallas_src>
import functools

import jax
import jax.numpy as jnp
from jax.experimental import pallas as pl
from jax.experimental.pallas import tpu as pltpu


def _round_up(x, m):
    return ((x + m - 1) // m) * m


# ----------------------------------------------------------------------------
# Kernel
# ----------------------------------------------------------------------------
def _decoder_kernel(r_ref, z_ref, x_ref, w1r_ref, w1z_ref, w1x_ref, b1_ref,
                    w2_ref, wh_ref, bh_ref, out_ref, *, min_std, y_dim):
    f32 = jnp.float32
    cd = w2_ref.dtype  # MXU operand (compute) dtype — weights pre-cast host-side

    # layer 1: future transform + its bias folded into w1x / b1; the input
    # concat is replaced by three dots on the split weight (f32 accumulation).
    h = (jnp.dot(r_ref[...].astype(cd), w1r_ref[...], preferred_element_type=f32)
         + jnp.dot(z_ref[...].astype(cd), w1z_ref[...], preferred_element_type=f32)
         + jnp.dot(x_ref[...].astype(cd), w1x_ref[...], preferred_element_type=f32)
         + b1_ref[...])
    h = jnp.maximum(h, 0.0)

    # layer 2 (bias-free ReLU block)
    h = jnp.dot(h.astype(cd), w2_ref[...], preferred_element_type=f32)
    h = jnp.maximum(h, 0.0)

    # final linear folded into the fused heads: [tile, 2*y] = [mean | log_sigma]
    heads = jnp.dot(h.astype(cd), wh_ref[...], preferred_element_type=f32) + bh_ref[...]

    log_sigma = heads[:, y_dim:]
    sigma = min_std + (1.0 - min_std) * jax.nn.softplus(log_sigma)

    # Output slab [mean | log_sigma | sigma]: first 2*y_dim columns are exactly
    # `heads`, so no in-kernel concatenate — just two stores.
    out_ref[:, : 2 * y_dim] = heads.astype(out_ref.dtype)
    out_ref[:, 2 * y_dim:] = sigma.astype(out_ref.dtype)


# ----------------------------------------------------------------------------
# Host-side parameter folding (exact algebra, done once)
# ----------------------------------------------------------------------------
def fold_params(params, hidden, latent, compute_dtype=jnp.bfloat16, lane=128):
    f32 = jnp.float32
    hi = jax.lax.Precision.HIGHEST

    w1 = params["w1"].astype(f32)
    hd2 = w1.shape[0]
    rz = hidden + latent

    # Fold the future transform (no nonlinearity between wft and w1), and split
    # w1 by input stream so the kernel never needs a concatenated input.
    w1_r = w1[:hidden, :]                                                 # [hidden, hd2]
    w1_z = w1[hidden:rz, :]                                               # [latent, hd2]
    w1_x = jnp.dot(params["wft"].astype(f32), w1[rz:, :], precision=hi)   # [x_dim, hd2]
    b1 = jnp.dot(params["bft"].astype(f32), w1[rz:, :], precision=hi)     # [1, hd2]

    # Fold final linear (w3, b3) into the heads and fuse them: [mean | log_sigma].
    w_heads = jnp.concatenate([params["wm"], params["ws"]], axis=1).astype(f32)  # [hd2, 2y]
    b_heads = jnp.concatenate([params["bm"], params["bs"]], axis=1).astype(f32)  # [1, 2y]
    wh = jnp.dot(params["w3"].astype(f32), w_heads, precision=hi)                # [hd2, 2y]
    bh = jnp.dot(params["b3"].astype(f32), w_heads, precision=hi) + b_heads      # [1, 2y]

    w2 = params["w2"].astype(f32)

    # Zero-pad the hidden width (96) to a 128-lane multiple so intermediates are
    # lane-aligned.  Deliberately NOT padded to 256 and the HBM input feature
    # dims are NOT padded: the kernel is bandwidth-bound, not MXU-bound.
    hd2_pad = _round_up(hd2, lane)
    pc = hd2_pad - hd2
    w1_r = jnp.pad(w1_r, ((0, 0), (0, pc)))
    w1_z = jnp.pad(w1_z, ((0, 0), (0, pc)))
    w1_x = jnp.pad(w1_x, ((0, 0), (0, pc)))
    b1 = jnp.pad(b1, ((0, 0), (0, pc)))
    w2 = jnp.pad(w2, ((0, pc), (0, pc)))
    wh = jnp.pad(wh, ((0, pc), (0, 0)))

    cd = compute_dtype
    # Biases stay f32: they are added to f32 accumulators.
    return dict(w1r=w1_r.astype(cd), w1z=w1_z.astype(cd), w1x=w1_x.astype(cd),
                b1=b1, w2=w2.astype(cd), wh=wh.astype(cd), bh=bh)


# ----------------------------------------------------------------------------
# Wrapper
# ----------------------------------------------------------------------------
def decoder_forward(params, r, z, future_x, *, min_std=0.01, row_tile=None,
                    compute_dtype=jnp.bfloat16, out_dtype=jnp.float32):
    """r: [B,T,hidden], z: [B,T,latent], future_x: [B,T,x_dim]
       -> (mean, sigma, log_sigma), each [B,T,y_dim] (out_dtype)."""
    B, T, hidden = r.shape
    latent = z.shape[-1]
    x_dim = future_x.shape[-1]
    y_dim = params["wm"].shape[1]
    N = B * T

    folded = fold_params(params, hidden, latent, compute_dtype)

    # Metadata-only row-major flattening.  No concat, no pad, no cast in the
    # wrapper — the dominant HBM streams are consumed directly by the kernel.
    r2 = r.reshape(N, hidden)
    z2 = z.reshape(N, latent)
    x2 = future_x.reshape(N, x_dim)

    # Row-tile choice:
    #  * tiny N  -> one (near-)exact block;
    #  * large N -> >= ~4 grid steps (keeps both v7x TensorCores busy under the
    #    "parallel" axis) with tiles up to 4096 rows, which amortizes the
    #    ~0.35 us/step pipeline overhead and stays under every generation's
    #    default scoped-VMEM limit (incl. v5e's 16 MiB) even for f32 inputs.
    if row_tile is None:
        if N <= 256:
            row_tile = _round_up(N, 8)
        else:
            row_tile = max(256, min(4096, _round_up(N // 4, 256)))
    row_tile = max(8, _round_up(row_tile, 8))

    grid = (pl.cdiv(N, row_tile),)   # ragged last block handled by Pallas masking

    def rows_spec(d):
        return pl.BlockSpec((row_tile, d), lambda i: (i, 0))

    def full_spec(shape):
        return pl.BlockSpec(shape, lambda i: (0, 0))

    in_specs = [
        rows_spec(hidden),               # r rows
        rows_spec(latent),               # z rows
        rows_spec(x_dim),                # future_x rows
        full_spec(folded["w1r"].shape),
        full_spec(folded["w1z"].shape),
        full_spec(folded["w1x"].shape),
        full_spec(folded["b1"].shape),
        full_spec(folded["w2"].shape),
        full_spec(folded["wh"].shape),
        full_spec(folded["bh"].shape),
    ]
    out_specs = pl.BlockSpec((row_tile, 3 * y_dim), lambda i: (i, 0))
    out_shape = jax.ShapeDtypeStruct((N, 3 * y_dim), out_dtype)

    kernel = functools.partial(_decoder_kernel, min_std=min_std, y_dim=y_dim)

    out = pl.pallas_call(
        kernel,
        out_shape=out_shape,
        grid_spec=pltpu.PrefetchScalarGridSpec(
            num_scalar_prefetch=0,
            grid=grid,
            in_specs=in_specs,
            out_specs=out_specs,
        ),
        compiler_params=pltpu.CompilerParams(
            dimension_semantics=("parallel",)),
    )(r2, z2, x2, folded["w1r"], folded["w1z"], folded["w1x"], folded["b1"],
      folded["w2"], folded["wh"], folded["bh"])

    mean = out[:, :y_dim].reshape(B, T, y_dim)
    log_sigma = out[:, y_dim:2 * y_dim].reshape(B, T, y_dim)
    sigma = out[:, 2 * y_dim:].reshape(B, T, y_dim)
    return mean, sigma, log_sigma


# ----------------------------------------------------------------------------
# Parameter init + references
# ----------------------------------------------------------------------------
def init_params(key, x_dim, y_dim, hidden_dim=32, latent_dim=32,
                use_deterministic_path=True):
    """Deterministic synthetic parameters with the shapes implied by Decoder.__init__."""
    hd2 = (2 * hidden_dim + latent_dim) if use_deterministic_path else (hidden_dim + latent_dim)
    ks = jax.random.split(key, 10)

    def w(k, i, o):
        return jax.random.normal(k, (i, o), jnp.float32) / jnp.sqrt(jnp.float32(i))

    def b(k, o):
        return 0.1 * jax.random.normal(k, (1, o), jnp.float32)

    return dict(
        wft=w(ks[0], x_dim, hidden_dim), bft=b(ks[1], hidden_dim),   # _future_transform
        w1=w(ks[2], hd2, hd2),                                        # BatchMLP.initial (no bias)
        w2=w(ks[3], hd2, hd2),                                        # BatchMLP.encoder[0] (no bias)
        w3=w(ks[4], hd2, hd2), b3=b(ks[5], hd2),                      # BatchMLP.final (bias)
        wm=w(ks[6], hd2, y_dim), bm=b(ks[7], y_dim),                  # _mean
        ws=w(ks[8], hd2, y_dim), bs=b(ks[9], y_dim),                  # _std
    )


def _reference_forward(params, r, z, future_x, min_std=0.01):
    """Pure-JAX reference of the original (unfolded) forward pass."""
    x = future_x @ params["wft"] + params["bft"][0]
    cat = jnp.concatenate([r, z, x], axis=-1)
    h = jax.nn.relu(cat @ params["w1"])
    h = jax.nn.relu(h @ params["w2"])
    h = h @ params["w3"] + params["b3"][0]
    mean = h @ params["wm"] + params["bm"][0]
    log_sigma = h @ params["ws"] + params["bs"][0]
    sigma = min_std + (1 - min_std) * jax.nn.softplus(log_sigma)
    return mean, sigma, log_sigma


def _reference_forward_folded(params, r, z, future_x, min_std, compute_dtype):
    """Pure-JAX mirror of the kernel math (same folds, same cast points)."""
    B, T, hidden = r.shape
    latent = z.shape[-1]
    y_dim = params["wm"].shape[1]
    N = B * T
    f32 = jnp.float32
    cd = compute_dtype
    fd = fold_params(params, hidden, latent, compute_dtype)
    r2 = r.reshape(N, hidden).astype(cd)
    z2 = z.reshape(N, latent).astype(cd)
    x2 = future_x.reshape(N, -1).astype(cd)
    h = (jnp.dot(r2, fd["w1r"], preferred_element_type=f32)
         + jnp.dot(z2, fd["w1z"], preferred_element_type=f32)
         + jnp.dot(x2, fd["w1x"], preferred_element_type=f32)
         + fd["b1"])
    h = jax.nn.relu(h)
    h = jax.nn.relu(jnp.dot(h.astype(cd), fd["w2"], preferred_element_type=f32))
    heads = jnp.dot(h.astype(cd), fd["wh"], preferred_element_type=f32) + fd["bh"]
    mean = heads[:, :y_dim].reshape(B, T, y_dim)
    log_sigma = heads[:, y_dim:].reshape(B, T, y_dim)
    sigma = min_std + (1 - min_std) * jax.nn.softplus(log_sigma)
    return mean, sigma, log_sigma


if __name__ == "__main__":
    B, T = 2, 8
    x_dim, y_dim = 4, 2
    hidden_dim, latent_dim = 32, 32
    min_std = 0.01

    key = jax.random.PRNGKey(0)
    kp, kr, kz, kx = jax.random.split(key, 4)

    params = init_params(kp, x_dim, y_dim, hidden_dim, latent_dim)
    r = jax.random.normal(kr, (B, T, hidden_dim), jnp.float32)
    z = jax.random.normal(kz, (B, T, latent_dim), jnp.float32)
    future_x = jax.random.normal(kx, (B, T, x_dim), jnp.float32)

    # ---- default path: bf16 MXU operands (perf config on v5e/v6e/v7x) ------
    mean, sigma, log_sigma = decoder_forward(params, r, z, future_x, min_std=min_std)
    jax.block_until_ready((mean, sigma, log_sigma))

    fm, fs, fl = _reference_forward_folded(params, r, z, future_x, min_std, jnp.bfloat16)
    assert jnp.allclose(mean, fm, atol=2e-2, rtol=2e-2)
    assert jnp.allclose(sigma, fs, atol=2e-2, rtol=2e-2)
    assert jnp.allclose(log_sigma, fl, atol=2e-2, rtol=2e-2)

    # ---- f32-operand path: tight numerical + semantic checks ----------------
    mean32, sigma32, ls32 = decoder_forward(
        params, r, z, future_x, min_std=min_std, compute_dtype=jnp.float32)
    jax.block_until_ready((mean32, sigma32, ls32))

    fm32, fs32, fl32 = _reference_forward_folded(params, r, z, future_x, min_std, jnp.float32)
    assert jnp.allclose(mean32, fm32, atol=1e-3, rtol=1e-3)
    assert jnp.allclose(sigma32, fs32, atol=1e-3, rtol=1e-3)
    assert jnp.allclose(ls32, fl32, atol=1e-3, rtol=1e-3)

    rm, rs, rl = _reference_forward(params, r, z, future_x, min_std)
    assert jnp.allclose(mean32, rm, atol=5e-2, rtol=5e-2)
    assert jnp.allclose(sigma32, rs, atol=5e-2, rtol=5e-2)
    assert jnp.allclose(ls32, rl, atol=5e-2, rtol=5e-2)

    print("KERNEL_OK")
</pallas_src>

<mosaic_0001>
module attributes {stable_mosaic.version = 11 : i64} {
  func.func @_decoder_kernel(%arg0: i32, %arg1: memref<16x32xf32, #tpu.memory_space<vmem>>, %arg2: memref<16x32xf32, #tpu.memory_space<vmem>>, %arg3: memref<16x4xf32, #tpu.memory_space<vmem>>, %arg4: memref<32x128xbf16, #tpu.memory_space<vmem>>, %arg5: memref<32x128xbf16, #tpu.memory_space<vmem>>, %arg6: memref<4x128xbf16, #tpu.memory_space<vmem>>, %arg7: memref<1x128xf32, #tpu.memory_space<vmem>>, %arg8: memref<128x128xbf16, #tpu.memory_space<vmem>>, %arg9: memref<128x4xbf16, #tpu.memory_space<vmem>>, %arg10: memref<1x4xf32, #tpu.memory_space<vmem>>, %arg11: memref<16x6xf32, #tpu.memory_space<vmem>>) attributes {dimension_semantics = [#tpu.dimension_semantics<parallel>], iteration_bounds = array<i64: 1>, scalar_prefetch = 0 : i64, scratch_operands = 0 : i64, tpu.core_type = #tpu.core_type<tc>, window_params = [{transform_indices = @transform_0, window_bounds = array<i64: 16, 32>}, {transform_indices = @transform_1, window_bounds = array<i64: 16, 32>}, {transform_indices = @transform_2, window_bounds = array<i64: 16, 4>}, {pipeline_mode = #tpu.pipeline_mode<synchronous>, transform_indices = @transform_3, window_bounds = array<i64: 32, 128>}, {pipeline_mode = #tpu.pipeline_mode<synchronous>, transform_indices = @transform_4, window_bounds = array<i64: 32, 128>}, {pipeline_mode = #tpu.pipeline_mode<synchronous>, transform_indices = @transform_5, window_bounds = array<i64: 4, 128>}, {pipeline_mode = #tpu.pipeline_mode<synchronous>, transform_indices = @transform_6, window_bounds = array<i64: 1, 128>}, {pipeline_mode = #tpu.pipeline_mode<synchronous>, transform_indices = @transform_7, window_bounds = array<i64: 128, 128>}, {pipeline_mode = #tpu.pipeline_mode<synchronous>, transform_indices = @transform_8, window_bounds = array<i64: 128, 4>}, {pipeline_mode = #tpu.pipeline_mode<synchronous>, transform_indices = @transform_9, window_bounds = array<i64: 1, 4>}, {transform_indices = @transform_10, window_bounds = array<i64: 16, 6>}]} {
    %c0 = arith.constant 0 : index
    %c0_0 = arith.constant 0 : index
    %0 = vector.load %arg1[%c0, %c0_0] : memref<16x32xf32, #tpu.memory_space<vmem>>, vector<16x32xf32>
    %1 = arith.truncf %0 : vector<16x32xf32> to vector<16x32xbf16>
    %c0_1 = arith.constant 0 : index
    %c0_2 = arith.constant 0 : index
    %2 = vector.load %arg4[%c0_1, %c0_2] : memref<32x128xbf16, #tpu.memory_space<vmem>>, vector<32x128xbf16>
    %cst = arith.constant dense<0.000000e+00> : vector<16x128xf32>
    %3 = tpu.matmul %1, %2, %cst {dimension_numbers = #tpu.dot_dimension_numbers<[1], [0], [0], [1], [0, 0, 1, 1], [], []>} : vector<16x32xbf16>, vector<32x128xbf16>, vector<16x128xf32> -> vector<16x128xf32>
    %c0_3 = arith.constant 0 : index
    %c0_4 = arith.constant 0 : index
    %4 = vector.load %arg2[%c0_3, %c0_4] : memref<16x32xf32, #tpu.memory_space<vmem>>, vector<16x32xf32>
    %5 = arith.truncf %4 : vector<16x32xf32> to vector<16x32xbf16>
    %c0_5 = arith.constant 0 : index
    %c0_6 = arith.constant 0 : index
    %6 = vector.load %arg5[%c0_5, %c0_6] : memref<32x128xbf16, #tpu.memory_space<vmem>>, vector<32x128xbf16>
    %cst_7 = arith.constant dense<0.000000e+00> : vector<16x128xf32>
    %7 = tpu.matmul %5, %6, %cst_7 {dimension_numbers = #tpu.dot_dimension_numbers<[1], [0], [0], [1], [0, 0, 1, 1], [], []>} : vector<16x32xbf16>, vector<32x128xbf16>, vector<16x128xf32> -> vector<16x128xf32>
    %8 = arith.addf %3, %7 : vector<16x128xf32>
    %c0_8 = arith.constant 0 : index
    %c0_9 = arith.constant 0 : index
    %9 = vector.load %arg3[%c0_8, %c0_9] : memref<16x4xf32, #tpu.memory_space<vmem>>, vector<16x4xf32>
    %10 = arith.truncf %9 : vector<16x4xf32> to vector<16x4xbf16>
    %c0_10 = arith.constant 0 : index
    %c0_11 = arith.constant 0 : index
    %11 = vector.load %arg6[%c0_10, %c0_11] : memref<4x128xbf16, #tpu.memory_space<vmem>>, vector<4x128xbf16>
    %cst_12 = arith.constant dense<0.000000e+00> : vector<16x128xf32>
    %12 = tpu.matmul %10, %11, %cst_12 {dimension_numbers = #tpu.dot_dimension_numbers<[1], [0], [0], [1], [0, 0, 1, 1], [], []>} : vector<16x4xbf16>, vector<4x128xbf16>, vector<16x128xf32> -> vector<16x128xf32>
    %13 = arith.addf %8, %12 : vector<16x128xf32>
    %c0_13 = arith.constant 0 : index
    %c0_14 = arith.constant 0 : index
    %14 = vector.load %arg7[%c0_13, %c0_14] : memref<1x128xf32, #tpu.memory_space<vmem>>, vector<1x128xf32>
    %15 = vector.broadcast %14 : vector<1x128xf32> to vector<16x128xf32>
    %16 = arith.addf %13, %15 : vector<16x128xf32>
    %cst_15 = arith.constant 0.000000e+00 : f32
    %17 = vector.broadcast %cst_15 : f32 to vector<16x128xf32>
    %18 = arith.maximumf %16, %17 : vector<16x128xf32>
    %19 = arith.truncf %18 : vector<16x128xf32> to vector<16x128xbf16>
    %c0_16 = arith.constant 0 : index
    %c0_17 = arith.constant 0 : index
    %20 = vector.load %arg8[%c0_16, %c0_17] : memref<128x128xbf16, #tpu.memory_space<vmem>>, vector<128x128xbf16>
    %cst_18 = arith.constant dense<0.000000e+00> : vector<16x128xf32>
    %21 = tpu.matmul %19, %20, %cst_18 {dimension_numbers = #tpu.dot_dimension_numbers<[1], [0], [0], [1], [0, 0, 1, 1], [], []>} : vector<16x128xbf16>, vector<128x128xbf16>, vector<16x128xf32> -> vector<16x128xf32>
    %cst_19 = arith.constant 0.000000e+00 : f32
    %22 = vector.broadcast %cst_19 : f32 to vector<16x128xf32>
    %23 = arith.maximumf %21, %22 : vector<16x128xf32>
    %24 = arith.truncf %23 : vector<16x128xf32> to vector<16x128xbf16>
    %c0_20 = arith.constant 0 : index
    %c0_21 = arith.constant 0 : index
    %25 = vector.load %arg9[%c0_20, %c0_21] : memref<128x4xbf16, #tpu.memory_space<vmem>>, vector<128x4xbf16>
    %cst_22 = arith.constant dense<0.000000e+00> : vector<16x4xf32>
    %26 = tpu.matmul %24, %25, %cst_22 {dimension_numbers = #tpu.dot_dimension_numbers<[1], [0], [0], [1], [0, 0, 1, 1], [], []>} : vector<16x128xbf16>, vector<128x4xbf16>, vector<16x4xf32> -> vector<16x4xf32>
    %c0_23 = arith.constant 0 : index
    %c0_24 = arith.constant 0 : index
    %27 = vector.load %arg10[%c0_23, %c0_24] : memref<1x4xf32, #tpu.memory_space<vmem>>, vector<1x4xf32>
    %28 = vector.broadcast %27 : vector<1x4xf32> to vector<16x4xf32>
    %29 = arith.addf %26, %28 : vector<16x4xf32>
    %30 = vector.extract_strided_slice %29 {offsets = [0, 2], sizes = [16, 2], strides = [1, 1]} : vector<16x4xf32> to vector<16x2xf32>
    %cst_25 = arith.constant 0.000000e+00 : f32
    %31 = vector.broadcast %cst_25 : f32 to vector<16x2xf32>
    %32 = arith.maximumf %30, %31 : vector<16x2xf32>
    %33 = vector.broadcast %cst_25 : f32 to vector<16x2xf32>
    %34 = arith.subf %30, %33 : vector<16x2xf32>
    %35 = arith.cmpf one, %34, %34 : vector<16x2xf32>
    %36 = vector.broadcast %cst_25 : f32 to vector<16x2xf32>
    %37 = arith.addf %30, %36 : vector<16x2xf32>
    %38 = math.absf %34 : vector<16x2xf32>
    %cst_26 = arith.constant 0.000000e+00 : f32
    %39 = vector.broadcast %cst_26 : f32 to vector<16x2xf32>
    %40 = arith.subf %39, %38 : vector<16x2xf32>
    %41 = math.exp %40 : vector<16x2xf32>
    %42 = math.log1p %41 : vector<16x2xf32>
    %43 = arith.addf %32, %42 : vector<16x2xf32>
    %44 = arith.select %35, %37, %43 : vector<16x2xi1>, vector<16x2xf32>
    %cst_27 = arith.constant 9.900000e-01 : f32
    %45 = vector.broadcast %cst_27 : f32 to vector<16x2xf32>
    %46 = arith.mulf %45, %44 : vector<16x2xf32>
    %cst_28 = arith.constant 0.00999999977 : f32
    %47 = vector.broadcast %cst_28 : f32 to vector<16x2xf32>
    %48 = arith.addf %47, %46 : vector<16x2xf32>
    %c0_29 = arith.constant 0 : index
    %c0_30 = arith.constant 0 : index
    %49 = vector.load %arg11[%c0_29, %c0_30] : memref<16x6xf32, #tpu.memory_space<vmem>>, vector<16x4xf32>
    tpu.vector_store %arg11[%c0_29, %c0_30], %29 {strides = array<i32>} : memref<16x6xf32, #tpu.memory_space<vmem>>, vector<16x4xf32>,
    %c0_31 = arith.constant 0 : index
    %c4 = arith.constant 4 : index
    %50 = vector.load %arg11[%c0_31, %c4] : memref<16x6xf32, #tpu.memory_space<vmem>>, vector<16x2xf32>
    tpu.vector_store %arg11[%c0_31, %c4], %48 {strides = array<i32>} : memref<16x6xf32, #tpu.memory_space<vmem>>, vector<16x2xf32>,
    return
  }
  func.func @transform_0(%arg0: i32) -> (i32, i32) {
    %c0_i32 = arith.constant 0 : i32
    %c0_i32_0 = arith.constant 0 : i32
    return %arg0, %c0_i32 : i32, i32
  }
  func.func @transform_1(%arg0: i32) -> (i32, i32) {
    %c0_i32 = arith.constant 0 : i32
    %c0_i32_0 = arith.constant 0 : i32
    return %arg0, %c0_i32 : i32, i32
  }
  func.func @transform_2(%arg0: i32) -> (i32, i32) {
    %c0_i32 = arith.constant 0 : i32
    %c0_i32_0 = arith.constant 0 : i32
    return %arg0, %c0_i32 : i32, i32
  }
  func.func @transform_3(%arg0: i32) -> (i32, i32) {
    %c0_i32 = arith.constant 0 : i32
    %c0_i32_0 = arith.constant 0 : i32
    %c0_i32_1 = arith.constant 0 : i32
    return %c0_i32, %c0_i32_0 : i32, i32
  }
  func.func @transform_4(%arg0: i32) -> (i32, i32) {
    %c0_i32 = arith.constant 0 : i32
    %c0_i32_0 = arith.constant 0 : i32
    %c0_i32_1 = arith.constant 0 : i32
    return %c0_i32, %c0_i32_0 : i32, i32
  }
  func.func @transform_5(%arg0: i32) -> (i32, i32) {
    %c0_i32 = arith.constant 0 : i32
    %c0_i32_0 = arith.constant 0 : i32
    %c0_i32_1 = arith.constant 0 : i32
    return %c0_i32, %c0_i32_0 : i32, i32
  }
  func.func @transform_6(%arg0: i32) -> (i32, i32) {
    %c0_i32 = arith.constant 0 : i32
    %c0_i32_0 = arith.constant 0 : i32
    %c0_i32_1 = arith.constant 0 : i32
    return %c0_i32, %c0_i32_0 : i32, i32
  }
  func.func @transform_7(%arg0: i32) -> (i32, i32) {
    %c0_i32 = arith.constant 0 : i32
    %c0_i32_0 = arith.constant 0 : i32
    %c0_i32_1 = arith.constant 0 : i32
    return %c0_i32, %c0_i32_0 : i32, i32
  }
  func.func @transform_8(%arg0: i32) -> (i32, i32) {
    %c0_i32 = arith.constant 0 : i32
    %c0_i32_0 = arith.constant 0 : i32
    %c0_i32_1 = arith.constant 0 : i32
    return %c0_i32, %c0_i32_0 : i32, i32
  }
  func.func @transform_9(%arg0: i32) -> (i32, i32) {
    %c0_i32 = arith.constant 0 : i32
    %c0_i32_0 = arith.constant 0 : i32
    %c0_i32_1 = arith.constant 0 : i32
    return %c0_i32, %c0_i32_0 : i32, i32
  }
  func.func @transform_10(%arg0: i32) -> (i32, i32) {
    %c0_i32 = arith.constant 0 : i32
    %c0_i32_0 = arith.constant 0 : i32
    return %arg0, %c0_i32 : i32, i32
  }
}

</mosaic_0001>

<bundles_post_ra>
// kernel: tpu_custom_call.1
= control target key start
LH: loop header
LB: loop body
LE: loop exit
PB: predicated region body
PF: predicated region fallthrough
CT: control target
= control target key end

     0   :  { %15 = vsyncpa [#allocation3], 0  ;;  %s951_s0 = inlined_call_operand.vmem [shape: f32[16,32], index: 0, kind: input, shape index: {}]   ;;  %s952_s1 = inlined_call_operand.vmem [shape: f32[16,32], index: 1, kind: input, shape index: {}]   ;;  %s953_s2 = inlined_call_operand.vmem [shape: f32[16,4], index: 2, kind: input, shape index: {}]   ;;  %s954_s3 = inlined_call_operand.hbm [shape: bf16[32,128], index: 3, kind: input, shape index: {}]   ;;  %s955_s4 = inlined_call_operand.hbm [shape: bf16[32,128], index: 4, kind: input, shape index: {}]   ;;  %s956_s5 = inlined_call_operand.vmem [shape: bf16[4,128], index: 5, kind: input, shape index: {}]   ;;  %s957_s6 = inlined_call_operand.hbm [shape: f32[1,128], index: 6, kind: input, shape index: {}]   ;;  %s958_s7 = inlined_call_operand.vmem [shape: bf16[128,128], index: 7, kind: input, shape index: {}]   ;;  %s959_s8 = inlined_call_operand.vmem [shape: bf16[128,4], index: 8, kind: input, shape index: {}]   ;;  %s960_s9 = inlined_call_operand.vmem [shape: f32[1,4], index: 9, kind: input, shape index: {}]   ;;  %s961_s10 = inlined_call_operand.vmem [shape: f32[16,6], index: 10, kind: output, shape index: {}]  }
   0x1   :  { %16 = vsyncpa [#allocation5], 0  ;;  %s761_s13 = smov [#allocation4]   ;;  %s762_s15 = smov [#allocation2]  }
   0x2   :  { %s40_s14 = sshll.u32 %s761_s13, 4  ;;  %s28_s16 = sshll.u32 %s762_s15, 4  ;;  %s41_s14 = int_to_ptr.vmem [resolvable:$true] %s40_s14  ;;  %s29_s16 = int_to_ptr.vmem [resolvable:$true] %s28_s16 }
   0x3   :  { %s705_s17 = scalar_lea.vmem %s41_s14, 256  ;;  %p710_p1 = scmp.lt.s32.totalorder %s41_s14, %s41_s14 }
   0x4   :  { %p706_p0 = scmp.ne.s32.totalorder %s41_s14, %s705_s17  ;;  %p711_p2 = scmp.lt.s32.totalorder %s705_s17, %s705_s17 }
   0x6   :  { %p712_p3 = por %p711_p2, %p710_p1 }
   0x8   :  { %p713_p4 = pnand %p712_p3, %p706_p0 }
   0xa   :  { %716 = shalt.err (!%p713_p4)
}
   0xb   :  { %s763_s18 = smov 64   ;;  %s764_s19 = smov 4  }
   0xc   :  { %46 = dma.hbm_to_vmem [thread:$0]  %s955_s4, 256, %s41_s14, [#allocation5], %s763_s18, %s763_s18, %s764_s19  }
   0xd   :  { %s725_s22 = scalar_lea.vmem %s29_s16, 256  ;;  %p730_p6 = scmp.lt.s32.totalorder %s29_s16, %s29_s16 }
   0xe   :  { %p726_p5 = scmp.ne.s32.totalorder %s29_s16, %s725_s22  ;;  %p731_p7 = scmp.lt.s32.totalorder %s725_s22, %s725_s22 }
  0x10   :  { %p732_p8 = por %p731_p7, %p730_p6 }
  0x12   :  { %p733_p9 = pnand %p732_p8, %p726_p5 }
  0x14   :  { %736 = shalt.err (!%p733_p9)
}
  0x15   :  { %34 = dma.hbm_to_vmem [thread:$0]  %s954_s3, 256, %s29_s16, [#allocation3], %s763_s18, %s763_s18, %s764_s19  }
  0x16   :  { %s765_s25 = smov [#allocation6]  }
  0x17   :  { %s55_s26 = sshll.u32 %s765_s25, 4  ;;  %s56_s26 = int_to_ptr.vmem [resolvable:$true] %s55_s26 }
  0x18   :  { %s745_s27 = scalar_lea.vmem %s56_s26, 16  ;;  %s749_s28 = scalar_lea.vmem %s56_s26, 32 }
  0x19   :  { %p746_p10 = scmp.ne.s32.totalorder %s56_s26, %s745_s27  ;;  %p750_p11 = scmp.lt.s32.totalorder %s56_s26, %s56_s26 }
  0x1a   :  { %p751_p12 = scmp.lt.s32.totalorder %s749_s28, %s745_s27 }
  0x1c   :  { %p752_p13 = por %p751_p12, %p750_p11 }
  0x1e   :  { %p753_p0 = pnand %p752_p13, %p746_p10 }
  0x20   :  { %756 = shalt.err (!%p753_p0)
}
  0x21   :  { %58 = dma.hbm_to_vmem [thread:$0]  %s957_s6, 16, %s56_s26, [#allocation5]  }
  0x22   :  { %757 = dma.done.wait [#allocation3], 256  }
  0x23   :  { %758 = vsyncadd [#allocation3], 4294967040 }
  0x24   :  { %759 = dma.done.wait [#allocation5], 272  }
  0x25   :  { %760 = vsyncadd [#allocation5], 4294967024  ;;  %v766_v0 = vmov 0.0   ;;  %vm767_vm0 = vmmov 0   ;;  %v669_v1 = vld [vmem:[#allocation4 + $0x8] sm:$0xff]   ;;  %v670_v2 = vld [vmem:[#allocation2 + $0x8] sm:$0xff]  }
  0x26   :  { %599 = vmatprep.subr.bf16.mxu0 %v766_v0  ;;  %607 = vmatprep.subr.bf16.mxu1 %v766_v0  ;;  %v671_v3 = vld [vmem:[#allocation4] sm:$0xff]   ;;  %v672_v4 = vld [vmem:[#allocation2] sm:$0xff]   ;;  %v83_v6 = vld [vmem:[%s952_s1 + $0x8] sm:$0xff]  ;;  %vm210_vm1 = vcmask 1041408   ;;  %vm101_vm2 = vcmask 261120   ;;  %vm206_vm3 = vcmask 31744  }
  0x27   :  { %603 = vmatprep.mubr.msk.bf16.mxu0 %vm767_vm0, %v766_v0  ;;  %611 = vmatprep.mubr.msk.bf16.mxu1 %vm767_vm0, %v766_v0  ;;  %v82_v5 = vld [vmem:[%s952_s1] sm:$0xff]  ;;  %v76_v9 = vld [vmem:[%s951_s0 + $0x8] sm:$0xff]  ;;  %v673_v13 = vld [vmem:[%s958_s7 + $0x38] sm:$0xff]   ;;  %vm539_vm8 = vcmask 48160  }
  0x28   :  { %600 = vmatpush3.bf16.msra.mxu0 %v669_v1  ;;  %608 = vmatpush3.bf16.msra.mxu1 %v670_v2  ;;  %v75_v7 = vld [vmem:[%s951_s0] sm:$0xff]  ;;  %v84_v8 = vpack.c.bf16 %v83_v6, %v82_v5  ;;  %v203_v15 = vld [vmem:[%s953_s2 + $0x8] sm:$0xff]  ;;  %v674_v16 = vld [vmem:[%s958_s7 + $0x30] sm:$0xff]  }
  0x29   :  { %601 = vmatprep.subr.bf16.mxu0 %v766_v0  ;;  %609 = vmatprep.subr.bf16.mxu1 %v766_v0  ;;  %v205_v10 = vld [vmem:[%s956_s5] sm:$0x3]  ;;  %v77_v11 = vpack.c.bf16 %v76_v9, %v75_v7  ;;  %v675_v18 = vld [vmem:[%s958_s7 + $0x28] sm:$0xff]   ;;  %v677_v20 = vld [vmem:[%s958_s7 + $0x18] sm:$0xff]  }
  0x2a   :  { %v212_v12 = vsel %vm210_vm1, %v205_v10, 0  ;;  %v202_v14 = vld [vmem:[%s953_s2] sm:$0xff]  ;;  %v678_v21 = vld [vmem:[%s958_s7 + $0x10] sm:$0xff]   ;;  %v679_v22 = vld [vmem:[%s958_s7 + $0x8] sm:$0xff]  }
  0x2b   :  { %v204_v17 = vpack.c.bf16 %v203_v15, %v202_v14  ;;  %v676_v19 = vld [vmem:[%s958_s7 + $0x20] sm:$0xff]   ;;  %v681_v24 = vld [vmem:[%s959_s8 + $0x38] sm:$0xff]   ;;  %v682_v25 = vld [vmem:[%s959_s8 + $0x30] sm:$0xff]  }
  0x2c   :  { %602 = vmatpush3.bf16.msra.mxu0 %v671_v3  ;;  %610 = vmatpush3.bf16.msra.mxu1 %v672_v4  ;;  %v680_v23 = vld [vmem:[%s958_s7] sm:$0xff]   ;;  %v683_v26 = vld [vmem:[%s959_s8 + $0x28] sm:$0xff]   ;;  %v685_v28 = vld [vmem:[%s959_s8 + $0x18] sm:$0xff]  }
  0x2d   :  { %615 = vmatprep.subr.bf16.mxu0 %v766_v0  ;;  %621 = vmatprep.subr.bf16.mxu1 %v766_v0  ;;  %v684_v27 = vld [vmem:[%s959_s8 + $0x20] sm:$0xff]   ;;  %v686_v29 = vld [vmem:[%s959_s8 + $0x10] sm:$0xff]   ;;  %v687_v52 = vld [vmem:[%s959_s8 + $0x8] sm:$0xff]  }
  0x2e   :  { %v555_v41 = vld [vmem:[#allocation6] ss:$0 sm:$0xff] }
  0x2f   :  { %604 = vmatmul.mubr.msk.bf16.vlgmr.msra.gmra.mxu0 %vm101_vm2, %v84_v8  ;;  %612 = vmatmul.mubr.msk.bf16.vlgmr.msra.gmra.mxu1 %vm101_vm2, %v77_v11  ;;  %v688_v53 = vld [vmem:[%s959_s8] sm:$0xff]  }
  0x30   :  { %616 = vmatpush3.bf16.msra.mxu0 %v212_v12  ;;  %617 = vmatprep.mubr.msk.bf16.mxu0 %vm767_vm0, %v766_v0  ;;  %v564_v61 = vld [vmem:[%s960_s9] ss:$0 sm:$0xff]  ;;  %s768_s9 = smov 2  }
  0x31   :  { %622 = vmatpush3.bf16.msra.mxu1 %v673_v13  ;;  %637 = vmatprep.mubr.msk.bf16.mxu1 %vm767_vm0, %v766_v0 }
  0x32   :  { %623 = vmatprep.subr.bf16.mxu1 %v766_v0  ;;  %641 = vmatprep.subr.bf16.mxu0 %v766_v0 }
  0x35   :  { %624 = vmatpush3.bf16.msra.mxu1 %v674_v16 }
  0x36   :  { %625 = vmatprep.subr.bf16.mxu1 %v766_v0 }
  0x37   :  { %618 = vmatmul.mubr.msk.bf16.vlgmr.msra.gmra.mxu0 %vm206_vm3, %v204_v17 }
  0x38   :  { %657 = vmatprep.mubr.msk.bf16.mxu0 %vm767_vm0, %v766_v0  ;;  %642 = vmatpush3.bf16.msra.mxu0 %v681_v24 }
  0x39   :  { %626 = vmatpush3.bf16.msra.mxu1 %v675_v18  ;;  %643 = vmatprep.subr.bf16.mxu0 %v766_v0 }
  0x3a   :  { %627 = vmatprep.subr.bf16.mxu1 %v766_v0 }
  0x3c   :  { %644 = vmatpush3.bf16.msra.mxu0 %v682_v25 }
  0x3d   :  { %628 = vmatpush3.bf16.msra.mxu1 %v676_v19  ;;  %645 = vmatprep.subr.bf16.mxu0 %v766_v0 }
  0x3e   :  { %629 = vmatprep.subr.bf16.mxu1 %v766_v0 }
  0x40   :  { %646 = vmatpush3.bf16.msra.mxu0 %v683_v26 }
  0x41   :  { %630 = vmatpush3.bf16.msra.mxu1 %v677_v20  ;;  %647 = vmatprep.subr.bf16.mxu0 %v766_v0 }
  0x42   :  { %631 = vmatprep.subr.bf16.mxu1 %v766_v0 }
  0x44   :  { %648 = vmatpush3.bf16.msra.mxu0 %v684_v27 }
  0x45   :  { %632 = vmatpush3.bf16.msra.mxu1 %v678_v21  ;;  %649 = vmatprep.subr.bf16.mxu0 %v766_v0 }
  0x46   :  { %633 = vmatprep.subr.bf16.mxu1 %v766_v0 }
  0x48   :  { %650 = vmatpush3.bf16.msra.mxu0 %v685_v28 }
  0x49   :  { %634 = vmatpush3.bf16.msra.mxu1 %v679_v22  ;;  %651 = vmatprep.subr.bf16.mxu0 %v766_v0 }
  0x4a   :  { %635 = vmatprep.subr.bf16.mxu1 %v766_v0 }
  0x4c   :  { %652 = vmatpush3.bf16.msra.mxu0 %v686_v29 }
  0x4d   :  { %636 = vmatpush3.bf16.msra.mxu1 %v680_v23  ;;  %653 = vmatprep.subr.bf16.mxu0 %v766_v0 }
  0x50   :  { %654 = vmatpush3.bf16.msra.mxu0 %v687_v52 }
  0x51   :  { %655 = vmatprep.subr.bf16.mxu0 %v766_v0 }
  0x54   :  { %656 = vmatpush3.bf16.msra.mxu0 %v688_v53 }
  0xef   :  { %v139_v30 = vpop.f32.mrf.mxu0  ;;  %v195_v31 = vpop.f32.mrf.mxu1 }
  0xf0   :  { %v196_v37 = vadd.f32 %v195_v31, %v139_v30 }
  0xf1   :  { %v605_v32 = vpop.f32.mrf.mxu0  ;;  %v613_v33 = vpop.f32.mrf.mxu1 }
  0xf3   :  { %v142_v34 = vpop.f32.mrf.mxu0  ;;  %v198_v35 = vpop.f32.mrf.mxu1 }
  0xf4   :  { %v199_v43 = vadd.f32 %v198_v35, %v142_v34 }
  0xf5   :  { %v606_v36 = vpop.f32.mrf.mxu0  ;;  %v614_v38 = vpop.f32.mrf.mxu1 }
  0xf7   :  { %v248_v39 = vpop.f32.mrf.mxu0 }
  0xf8   :  { %v255_v40 = vadd.f32 %v248_v39, %v196_v37 }
  0xf9   :  { %v619_v42 = vpop.f32.mrf.mxu0 }
  0xfa   :  { %v264_v45 = vadd.f32 %v555_v41, %v255_v40 }
  0xfb   :  { %v251_v44 = vpop.f32.mrf.mxu0 }
  0xfc   :  { %v256_v46 = vadd.f32 %v251_v44, %v199_v43  ;;  %v266_v49 = vmax.f32 %v264_v45, 0.0 }
  0xfd   :  { %v620_v47 = vpop.f32.mrf.mxu0 }
  0xfe   :  { %v265_v48 = vadd.f32 %v555_v41, %v256_v46 }
 0x100   :  { %v267_v50 = vmax.f32 %v265_v48, 0.0 }
 0x102   :  { %v268_v51 = vpack.c.bf16 %v267_v50, %v266_v49 }
 0x104   :  { %638 = vmatmul.mubr.bf16.vlgmr.msra.gmra.mxu1 %v268_v51 }
 0x1c4   :  { %v367_v54 = vpop.f32.mrf.mxu1 }
 0x1c5   :  { %v374_v57 = vmax.f32 %v367_v54, 0.0 }
 0x1c6   :  { %v639_v55 = vpop.f32.mrf.mxu1 }
 0x1c8   :  { %v370_v56 = vpop.f32.mrf.mxu1 }
 0x1c9   :  { %v375_v58 = vmax.f32 %v370_v56, 0.0 }
 0x1ca   :  { %v640_v59 = vpop.f32.mrf.mxu1 }
 0x1cb   :  { %v376_v60 = vpack.c.bf16 %v375_v58, %v374_v57 }
 0x1cd   :  { %658 = vmatmul.mubr.bf16.vlgmr.msra.gmra.mxu0 %v376_v60 }
 0x28d   :  { %v482_v62 = vpop.f32.mrf.mxu0 }
 0x28e   :  { %v483_v63 = vadd.f32 %v564_v61, %v482_v62 }
 0x28f   :  { %v659_v0 = vpop.f32.mrf.mxu0 }
 0x290   :  { %v495_v1 = vand.u32 2147483647, %v483_v63  ;;  %529 = vst.msk [vmem:[%s961_s10] sm:$0xff] %vm206_vm3, %v483_v63  ;;  %v489_v22 = vmax.f32 %v483_v63, 0.0  ;;  %vm491_vm5 = vcmp.ne.f32.partialorder %v483_v63, %v483_v63 }
 0x291   :  { %v485_v2 = vpop.f32.mrf.mxu0 }
 0x292   :  { %v497_v3 = vsub.f32 0.0, %v495_v1  ;;  %v486_v4 = vadd.f32 %v564_v61, %v485_v2 }
 0x293   :  { %v660_v5 = vpop.f32.mrf.mxu0 }
 0x294   :  { %v499_v6 = vmul.f32 1.442695, %v497_v3  ;;  %v496_v7 = vand.u32 2147483647, %v486_v4  ;;  %530 = vst.msk [vmem:[%s961_s10 + $0x8] sm:$0xff] %vm206_vm3, %v486_v4  ;;  %v490_v30 = vmax.f32 %v486_v4, 0.0  ;;  %vm492_vm7 = vcmp.ne.f32.partialorder %v486_v4, %v486_v4 }
 0x296   :  { %689 = vpow2.f32 %v499_v6  ;;  %v498_v8 = vsub.f32 0.0, %v496_v7 }
 0x298   :  { %v501_v9 = vmul.f32 1.442695, %v498_v8 }
 0x29a   :  { %691 = vpow2.f32 %v501_v9 }
 0x2a3   :  { %v690_v10 = vpop.eup %689 }
 0x2a4   :  { %v503_v11 = vadd.f32 1.0, %v690_v10  ;;  %v506_v14 = vmul.f32 -0.5, %v690_v10  ;;  %v509_v17 = vand.u32 2147483647, %v690_v10 }
 0x2a6   :  { %693 = vlog2.f32 %v503_v11  ;;  %v507_v15 = vadd.f32 1.0, %v506_v14  ;;  %vm510_vm4 = vcmp.lt.f32.partialorder %v509_v17, 0.0004427343 }
 0x2a7   :  { %v692_v12 = vpop.eup %691 }
 0x2a8   :  { %v512_v13 = vadd.f32 1.0, %v692_v12  ;;  %v515_v16 = vmul.f32 -0.5, %v692_v12  ;;  %v508_v20 = vmul.f32 %v690_v10, %v507_v15  ;;  %v518_v23 = vand.u32 2147483647, %v692_v12 }
 0x2aa   :  { %695 = vlog2.f32 %v512_v13  ;;  %v516_v21 = vadd.f32 1.0, %v515_v16  ;;  %vm519_vm6 = vcmp.lt.f32.partialorder %v518_v23, 0.0004427343 }
 0x2ac   :  { %v517_v28 = vmul.f32 %v692_v12, %v516_v21 }
 0x2b3   :  { %v694_v18 = vpop.eup %693 }
 0x2b4   :  { %v505_v19 = vmul.f32 0.6931472, %v694_v18 }
 0x2b6   :  { %v511_v24 = vsel %vm510_vm4, %v508_v20, %v505_v19 }
 0x2b7   :  { %v696_v25 = vpop.eup %695  ;;  %v521_v26 = vadd.f32 %v511_v24, %v489_v22 }
 0x2b8   :  { %v514_v27 = vmul.f32 0.6931472, %v696_v25 }
 0x2b9   :  { %v523_v29 = vsel %vm491_vm5, %v483_v63, %v521_v26 }
 0x2ba   :  { %v525_v31 = vmul.f32 0.99, %v523_v29  ;;  %v520_v32 = vsel %vm519_vm6, %v517_v28, %v514_v27 }
 0x2bb   :  { %v522_v33 = vadd.f32 %v520_v32, %v490_v30 }
 0x2bc   :  { %v527_v34 = vadd.f32 0.01, %v525_v31 }
 0x2bd   :  { %v524_v35 = vsel %vm492_vm7, %v486_v4, %v522_v33 }
 0x2be   :  { %533 = vrot.lane.b32.xlu0 %v527_v34, %s768_s9  ;;  %v526_v36 = vmul.f32 0.99, %v524_v35 }
 0x2c0   :  { %v528_v37 = vadd.f32 0.01, %v526_v36 }
 0x2c2   :  { %535 = vrot.lane.b32.xlu0 %v528_v37, %s768_s9 }
 0x330   :  { %v534_v38 = vpop.permute.xlu0 %533 }
 0x331   :  { %540 = vst.msk [vmem:[%s961_s10] sm:$0xff] %vm539_vm8, %v534_v38 }
 0x334   :  { %v536_v39 = vpop.permute.xlu0 %535 }
 0x335   :  { %541 = vst.msk [vmem:[%s961_s10 + $0x8] sm:$0xff] %vm539_vm8, %v536_v39 }
 0x336   :  { %546 = vsyncpa [#allocation3], 1 }
 0x337   :  { %547 = vsyncpa [#allocation5], 1 }

</bundles_post_ra>
